<compile_context>
chip_gen: v5e
topology: v5e:2x2
jax: 0.10.0
libtpu: 0.0.40
codegen_flags: <defaults>
</compile_context>

<pallas_src>
import functools

import jax
import jax.numpy as jnp
from jax.experimental import pallas as pl
from jax.experimental.pallas import tpu as pltpu


# ---------------------------------------------------------------------------
# Kernels
# ---------------------------------------------------------------------------

def _and_gate_fused_kernel(x_ref, o_ref, *, gate_count):
    # x_ref: (tb, 2*gate_count) full-width block, o_ref: (tb, gate_count).
    # Single contiguous load; split in-kernel (tile-aligned when gate_count % 128 == 0,
    # otherwise a cheap in-register lane shuffle — no extra HBM traffic either way).
    x = x_ref[...]
    a = x[:, :gate_count]
    b = x[:, gate_count:]
    one = jnp.asarray(1, dtype=o_ref.dtype)
    o_ref[...] = jnp.where(jnp.logical_and(a > 0, b > 0), one, -one)


def _and_gate_split_kernel(a_ref, b_ref, o_ref):
    # Wide-gate path: A/B operand tiles selected by BlockSpec feature-block indices.
    one = jnp.asarray(1, dtype=o_ref.dtype)
    o_ref[...] = jnp.where(jnp.logical_and(a_ref[...] > 0, b_ref[...] > 0), one, -one)


# ---------------------------------------------------------------------------
# Tiling helpers
# ---------------------------------------------------------------------------

def _round_up(x: int, m: int) -> int:
    return ((x + m - 1) // m) * m


# Target bytes for one (tb, gate_count) half-width block.  Live footprint per step is
# ~6x this (input block is 2x wide, everything double-buffered) -> ~12 MiB, safe under
# the explicit 32 MiB scoped-VMEM limit on v5e/v6e/v7x while large enough for roofline.
_TARGET_HALF_BLOCK_BYTES = 2 * 1024 * 1024
_VMEM_LIMIT_BYTES = 32 * 1024 * 1024
# Minimum grid steps so "parallel" can shard across v7x's 2 TCs and the pipeline overlaps.
_MIN_GRID_STEPS = 4


def _sublane(itemsize: int) -> int:
    # 8 rows for f32, 16 for bf16, 32 for int8.
    return max(8, 32 // max(1, itemsize))


def _choose_tile_b(batch: int, gate_count: int, itemsize: int) -> int:
    sub = _sublane(itemsize)
    per_row = max(1, gate_count * itemsize)
    tb = (_TARGET_HALF_BLOCK_BYTES // per_row) // sub * sub
    tb = max(tb, sub)
    # Keep at least ~_MIN_GRID_STEPS grid steps when the batch allows it.
    tb = min(tb, _round_up(-(-batch // _MIN_GRID_STEPS), sub))
    tb = max(tb, sub)
    tb = min(tb, _round_up(batch, sub))
    return tb


# ---------------------------------------------------------------------------
# pallas_call wrappers
# ---------------------------------------------------------------------------

def _run_and_gate_fused(x, batch, gate_count, in_features, out_dtype):
    itemsize = jnp.dtype(out_dtype).itemsize
    tb = _choose_tile_b(batch, gate_count, itemsize)
    grid = (pl.cdiv(batch, tb),)
    kernel = functools.partial(_and_gate_fused_kernel, gate_count=gate_count)
    return pl.pallas_call(
        kernel,
        out_shape=jax.ShapeDtypeStruct((batch, gate_count), out_dtype),
        grid_spec=pltpu.PrefetchScalarGridSpec(
            num_scalar_prefetch=0,
            grid=grid,
            # Last block dim equals the full array dim -> legal for any even in_features.
            in_specs=[pl.BlockSpec((tb, in_features), lambda i: (i, 0))],
            out_specs=pl.BlockSpec((tb, gate_count), lambda i: (i, 0)),
        ),
        compiler_params=pltpu.CompilerParams(
            dimension_semantics=("parallel",),
            vmem_limit_bytes=_VMEM_LIMIT_BYTES,
        ),
        cost_estimate=pl.CostEstimate(
            flops=4 * batch * gate_count,          # 2 cmp + 1 and + 1 select per output
            transcendentals=0,
            bytes_accessed=3 * batch * gate_count * itemsize,
        ),
    )(x)


def _run_and_gate_wide(x, batch, gate_count, out_dtype, feature_tile):
    """2-D grid (batch tiles x 128-multiple feature tiles) for very wide gate_count."""
    itemsize = jnp.dtype(out_dtype).itemsize
    sub = _sublane(itemsize)
    tb = (_TARGET_HALF_BLOCK_BYTES // max(1, feature_tile * itemsize)) // sub * sub
    tb = max(tb, sub)
    tb = min(tb, _round_up(-(-batch // _MIN_GRID_STEPS), sub))
    tb = max(tb, sub)
    tb = min(tb, _round_up(batch, sub))
    n_feat_blocks = gate_count // feature_tile
    grid = (pl.cdiv(batch, tb), n_feat_blocks)
    return pl.pallas_call(
        _and_gate_split_kernel,
        out_shape=jax.ShapeDtypeStruct((batch, gate_count), out_dtype),
        grid_spec=pltpu.PrefetchScalarGridSpec(
            num_scalar_prefetch=0,
            grid=grid,
            in_specs=[
                pl.BlockSpec((tb, feature_tile), lambda i, j: (i, j)),
                pl.BlockSpec((tb, feature_tile),
                             lambda i, j: (i, j + n_feat_blocks)),
            ],
            out_specs=pl.BlockSpec((tb, feature_tile), lambda i, j: (i, j)),
        ),
        compiler_params=pltpu.CompilerParams(
            dimension_semantics=("parallel", "parallel"),
            vmem_limit_bytes=_VMEM_LIMIT_BYTES,
        ),
        cost_estimate=pl.CostEstimate(
            flops=4 * batch * gate_count,
            transcendentals=0,
            bytes_accessed=3 * batch * gate_count * itemsize,
        ),
    )(x, x)


def _and_gate_reference(x: jax.Array, gate_count: int) -> jax.Array:
    both = jnp.logical_and(x[:, :gate_count] > 0, x[:, gate_count:] > 0)
    one = jnp.asarray(1, dtype=x.dtype)
    return jnp.where(both, one, -one)


# ---------------------------------------------------------------------------
# Module
# ---------------------------------------------------------------------------

class ANDGate:
    """JAX/Pallas equivalent of the PyTorch AND_Gate module (forward only)."""

    # Below this many bytes the op should fuse with its elementwise neighbours under XLA
    # (a pallas_call is a fusion barrier), so only dispatch to Pallas for big inputs.
    _PALLAS_MIN_BYTES = 1 << 20
    # If a single sublane-row block would exceed this, tile the feature axis too.
    _WIDE_GATE_BLOCK_BYTES = _TARGET_HALF_BLOCK_BYTES

    def __init__(self, alpha: float, debug__allows_any_alpha: bool = False):
        if not debug__allows_any_alpha:
            if alpha <= 0.0 or alpha > 1.0:
                raise Exception(
                    "if you know what you are doing, set debug__allows_any_alpha=True."
                )
        # alpha only participates in the (not implemented) custom backward.
        # TODO(synk): custom VJP matching AND_Gate_Function.backward (alpha-scaled grads).
        self.alpha = jnp.asarray([alpha], dtype=jnp.float32)

    def __call__(self, x: jax.Array, use_pallas: bool | None = None,
                 feature_tile: int | None = None) -> jax.Array:
        if x.ndim != 2:
            raise Exception(
                "Gates layers only accept rank-2 tensor. Shape: [batch, gate_count * 2]."
            )
        if x.shape[-1] % 2 != 0:
            raise Exception()
        if jnp.issubdtype(x.dtype, jnp.unsignedinteger):
            raise Exception("AND_Gate outputs -1; unsigned integer dtypes are unsupported.")

        batch, in_features = x.shape
        gate_count = in_features // 2
        itemsize = jnp.dtype(x.dtype).itemsize

        if use_pallas is None:
            use_pallas = x.size * itemsize >= self._PALLAS_MIN_BYTES
        if not use_pallas:
            return _and_gate_reference(x, gate_count)

        sub = _sublane(itemsize)
        wide = gate_count % 128 == 0 and (
            feature_tile is not None
            or sub * gate_count * itemsize > self._WIDE_GATE_BLOCK_BYTES
        )
        if wide:
            tg = feature_tile if feature_tile is not None else 128
            if feature_tile is None:
                while (gate_count % (tg * 2) == 0
                       and sub * tg * 2 * itemsize <= self._WIDE_GATE_BLOCK_BYTES):
                    tg *= 2
            if tg % 128 != 0 or gate_count % tg != 0:
                raise Exception("feature_tile must be a multiple of 128 dividing gate_count.")
            return _run_and_gate_wide(x, batch, gate_count, x.dtype, tg)

        # TODO(synk): gate_count not a multiple of 128 AND extremely wide (>~VMEM budget per
        # 8 rows) would need ragged feature tiling; not needed for typical gate widths.
        return _run_and_gate_fused(x, batch, gate_count, in_features, x.dtype)


# ---------------------------------------------------------------------------
# Self-test
# ---------------------------------------------------------------------------

if __name__ == "__main__":
    key = jax.random.PRNGKey(0)
    k0, k1, k2 = jax.random.split(key, 3)
    gate = ANDGate(alpha=0.5)

    # Case 1: lane-aligned gate_count, f32 — fused single-DMA path, grid has >= 2 steps.
    batch, gc = 16, 128  # in_features = 256
    x = jax.random.normal(k0, (batch, 2 * gc), dtype=jnp.float32)
    out = jax.block_until_ready(gate(x, use_pallas=True))
    ref = _and_gate_reference(x, gc)
    assert out.shape == (batch, gc) and out.dtype == x.dtype
    assert bool(jnp.all(out == ref))

    # Case 2: unaligned gate_count, bf16 — full-width block + in-kernel split, no pad copies.
    batch2, gc2 = 8, 48  # in_features = 96
    x2 = jax.random.normal(k1, (batch2, 2 * gc2), dtype=jnp.bfloat16)
    out2 = jax.block_until_ready(gate(x2, use_pallas=True))
    ref2 = _and_gate_reference(x2, gc2)
    assert out2.shape == (batch2, gc2) and out2.dtype == x2.dtype
    assert bool(jnp.all(out2 == ref2))

    # Case 3: forced 2-D (batch x feature) grid — the very-wide-gate future-proofing path.
    batch3, gc3 = 16, 256  # in_features = 512
    x3 = jax.random.normal(k2, (batch3, 2 * gc3), dtype=jnp.float32)
    out3 = jax.block_until_ready(gate(x3, use_pallas=True, feature_tile=128))
    ref3 = _and_gate_reference(x3, gc3)
    assert out3.shape == (batch3, gc3) and out3.dtype == x3.dtype
    assert bool(jnp.all(out3 == ref3))

    # Case 4: tiny-input auto dispatch takes the fused-XLA path and still matches.
    out4 = jax.block_until_ready(gate(x))
    assert bool(jnp.all(out4 == ref))

    print("KERNEL_OK")
</pallas_src>

<mosaic_0001>
module attributes {stable_mosaic.version = 11 : i64} {
  func.func @_and_gate_fused_kernel(%arg0: i32, %arg1: memref<8x256xf32, #tpu.memory_space<vmem>>, %arg2: memref<8x128xf32, #tpu.memory_space<vmem>>) attributes {dimension_semantics = [#tpu.dimension_semantics<parallel>], iteration_bounds = array<i64: 2>, scalar_prefetch = 0 : i64, scratch_operands = 0 : i64, tpu.core_type = #tpu.core_type<tc>, window_params = [{transform_indices = @transform_0, window_bounds = array<i64: 8, 256>}, {transform_indices = @transform_1, window_bounds = array<i64: 8, 128>}]} {
    %c0 = arith.constant 0 : index
    %c0_0 = arith.constant 0 : index
    %0 = vector.load %arg1[%c0, %c0_0] : memref<8x256xf32, #tpu.memory_space<vmem>>, vector<8x256xf32>
    %1 = vector.extract_strided_slice %0 {offsets = [0, 0], sizes = [8, 128], strides = [1, 1]} : vector<8x256xf32> to vector<8x128xf32>
    %2 = vector.extract_strided_slice %0 {offsets = [0, 128], sizes = [8, 128], strides = [1, 1]} : vector<8x256xf32> to vector<8x128xf32>
    %cst = arith.constant 0.000000e+00 : f32
    %3 = vector.broadcast %cst : f32 to vector<8x128xf32>
    %4 = arith.cmpf ogt, %1, %3 : vector<8x128xf32>
    %cst_1 = arith.constant 0.000000e+00 : f32
    %5 = vector.broadcast %cst_1 : f32 to vector<8x128xf32>
    %6 = arith.cmpf ogt, %2, %5 : vector<8x128xf32>
    %7 = arith.andi %4, %6 : vector<8x128xi1>
    %cst_2 = arith.constant 0.000000e+00 : f32
    %cst_3 = arith.constant 1.000000e+00 : f32
    %8 = arith.subf %cst_2, %cst_3 : f32
    %cst_4 = arith.constant 1.000000e+00 : f32
    %9 = vector.broadcast %cst_4 : f32 to vector<8x128xf32>
    %10 = vector.broadcast %8 : f32 to vector<8x128xf32>
    %11 = arith.select %7, %9, %10 : vector<8x128xi1>, vector<8x128xf32>
    %c0_5 = arith.constant 0 : index
    %c0_6 = arith.constant 0 : index
    %12 = vector.load %arg2[%c0_5, %c0_6] : memref<8x128xf32, #tpu.memory_space<vmem>>, vector<8x128xf32>
    tpu.vector_store %arg2[%c0_5, %c0_6], %11 {strides = array<i32>} : memref<8x128xf32, #tpu.memory_space<vmem>>, vector<8x128xf32>,
    return
  }
  func.func @transform_0(%arg0: i32) -> (i32, i32) {
    %c0_i32 = arith.constant 0 : i32
    %c0_i32_0 = arith.constant 0 : i32
    return %arg0, %c0_i32 : i32, i32
  }
  func.func @transform_1(%arg0: i32) -> (i32, i32) {
    %c0_i32 = arith.constant 0 : i32
    %c0_i32_0 = arith.constant 0 : i32
    return %arg0, %c0_i32 : i32, i32
  }
}

</mosaic_0001>

<bundles_post_ra>
// kernel: tpu_custom_call.1
= control target key start
LH: loop header
LB: loop body
LE: loop exit
PB: predicated region body
PF: predicated region fallthrough
CT: control target
= control target key end

     0   :  { %6 = vsyncpa [#allocation3], 0  ;;  %s526_s0 = inlined_call_operand.hbm [shape: f32[16,256], index: 0, kind: input, shape index: {}]   ;;  %s527_s1 = inlined_call_operand.hbm [shape: f32[16,128], index: 1, kind: output, shape index: {}]  }
   0x1   :  { %8 = vsyncpa [#allocation3 + $0x1], 0 }
   0x2   :  { %9 = vsyncpa [#allocation4], 0 }
   0x3   :  { %11 = vsyncpa [#allocation4 + $0x1], 0  ;;  %s398_s6 = smov 0   ;;  %s400_s7 = smov 0  }
   0x4   :  { %s402_s8 = smov 0   ;;  %s404_s9 = smov 0  }
   0x5 LB: > { %s419_s10 = sadd.s32 4294967295, %s385_s9   ;;  %s228_s11 = sadd.s32 4294967294, %s385_s9   ;;  %s385_s9 = sphi %s404_s9, %s537_s9   ;;  %s381_s8 = sphi %s402_s8, %s536_s8   ;;  %s377_s7 = sphi %s400_s7, %s535_s7   ;;  %s373_s6 = sphi %s398_s6, %s534_s6  }
   0x6   : > { %s423_s12 = sadd.s32 1, %s385_s9   ;;  %s24_s13 = sadd.s32 1, %s381_s8 }
   0x7   : > { %s21_s14 = ssub.s32 %s385_s9, %s423_s12  ;;  %p31_p0 = scmp.ne.s32.totalorder %s381_s8, %s377_s7 }
   0x8   : > { %p22_p1 = scmp.eq.s32.totalorder %s21_s14, 0  ;;  %p32_p2 = scmp.eq.s32.totalorder %s385_s9, 0 }
   0x9   : > { %p37_p3 = scmp.ne.s32.totalorder %s377_s7, %s373_s6  ;;  %p38_p4 = scmp.eq.s32.totalorder %s419_s10, 0 }
   0xa   : > { %s435_s15 = scalar_select %p22_p1, %s381_s8, %s24_s13  }
   0xb   : > { %p437_p5 = por %p32_p2, %p31_p0  ;;  %p441_p6 = por %p38_p4, %p37_p3 }
   0xc   : > { %p61_p7 = scmp.eq.s32.totalorder %s419_s10, 1  ;;  %p67_p8 = scmp.eq.s32.totalorder %s228_s11, 1 }
   0xd   : > { %p254_p10 = scmp.lt.s32.totalorder %s385_s9, 2  ;;  %s87_s20 = sand.u32 1, %s381_s8  }
   0xe   : > { %p448_p11 = por %p61_p7, %p31_p0  ;;  %p452_p12 = por %p67_p8, %p37_p3 }
   0xf   : > { %s241_s21 = sshll.u32 %s385_s9, 4  ;;  %s231_s22 = sshll.u32 %s87_s20, 4 }
  0x10   : > { %s96_s25 = scalar_lea.hbm %s526_s0, %s241_s21  ;;  %s91_s27 = scalar_lea.vmem [#allocation2], %s231_s22 }
  0x11   : > { %s98_s26 = sshll.u32 %s96_s25, 4  ;;  %s100_s28 = sshll.u32 %s91_s27, 4  ;;  %s99_s26 = int_to_ptr.hbm [resolvable:$true] %s98_s26  ;;  %s101_s28 = int_to_ptr.vmem [resolvable:$true] %s100_s28 }
  0x12   : > { %p463_p13 = pnand %p254_p10, %p437_p5  ;;  %p234_p0 = scmp.ge.s32.totalorder %s385_s9, 1 }
  0x13   : > { %p105_p1 = scmp.lt.s32.totalorder %s385_s9, 3  ;;  %s88_s30 = scalar_lea.sflag [#allocation3], %s87_s20 }
  0x14   : > { %s289_s2 = sshra.s32 %s99_s26, 4  ;;  %p293_p3 = pneg %p463_p13  ;;  %s290_s2 = int_to_ptr.hbm [resolvable:$true] %s289_s2 }
  0x15   : > { %s291_s3 = scalar_lea.hbm %s290_s2, 16  ;;  %s296_s11 = scalar_lea.hbm %s526_s0, 32 }
  0x16   : > { %p292_p2 = scmp.ne.s32.totalorder %s290_s2, %s291_s3  ;;  %p297_p5 = scmp.lt.s32.totalorder %s290_s2, %s526_s0 }
  0x17   : > { %p298_p8 = scmp.lt.s32.totalorder %s296_s11, %s291_s3 }
  0x18   : > { %p294_p4 = pnand %p293_p3, %p292_p2 }
  0x19   : > { %p299_p10 = por %p298_p8, %p297_p5 }
  0x1a   : > { %p295_p7 = pneg %p294_p4 }
  0x1c   : > { %p300_p9 = pnand %p299_p10, %p295_p7 }
  0x1e   : > { %303 = shalt.err (!%p300_p9)
}
  0x1f   : > { %249 = dma.hbm_to_vmem [thread:$0]  (!%p463_p13), %s99_s26, 256, %s101_s28, %s88_s30  }
  0x20   : > { %p106_p2 = pnand %p234_p0, %p105_p1 }
  0x21   : > { %s484_s16 = sand.u32 (!%p106_p2), 1, %s377_s7  }
  0x22   : > { %109 = sbr.rel (%p106_p2) target bundleno = 55 (0x37), region = 24  ;;  %s235_s20 = sshll.u32 (!%p106_p2), %s484_s16, 4 }
  0x23   : > { %s112_s21 = scalar_lea.sflag (!%p106_p2), [#allocation3], %s484_s16  ;;  %s115_s22 = scalar_lea.vmem (!%p106_p2), [#allocation2], %s235_s20 }
  0x27   : > { %364 = dma.done.wait (%p441_p6), %s112_s21, 256  }
  0x28   : > { %366 = vsyncadd (%p441_p6), %s112_s21, 4294967040  ;;  %s236_s23 = sshll.u32 %s484_s16, 3  ;;  %s238_s24 = sshll.u32 %s419_s10, 3  ;;  %v135_v0 = vld [vmem:[%s115_s22] sm:$0xff]  ;;  %v136_v1 = vld [vmem:[%s115_s22 + $0x8] sm:$0xff]  ;;  %v387_v2 = vmov -1.0  }
  0x29   : > { %s153_s27 = scalar_lea.hbm %s527_s1, %s238_s24  ;;  %s134_s28 = scalar_lea.vmem [#allocation5], %s236_s23  ;;  %vm137_vm0 = vcmp.gt.f32.partialorder %v135_v0, 0.0  ;;  %vm138_vm1 = vcmp.gt.f32.partialorder %v136_v1, 0.0 }
  0x2a   : > { %s155_s29 = sshll.u32 %s134_s28, 4  ;;  %s157_s30 = sshll.u32 %s153_s27, 4  ;;  %vm139_vm2 = vmand %vm137_vm0, %vm138_vm1  ;;  %s156_s29 = int_to_ptr.vmem [resolvable:$true] %s155_s29  ;;  %s158_s30 = int_to_ptr.hbm [resolvable:$true] %s157_s30 }
  0x2b   : > { %v140_v3 = vsel %vm139_vm2, 1.0, %v387_v2  ;;  %s143_s17 = scalar_lea.sflag [#allocation4], %s484_s16  ;;  %s333_s10 = sshra.s32 %s158_s30, 4  ;;  %s334_s10 = int_to_ptr.hbm [resolvable:$true] %s333_s10 }
  0x2c   : > { %141 = vst [vmem:[%s134_s28] sm:$0xff] %v140_v3  ;;  %s335_s2 = scalar_lea.hbm %s334_s10, 8  ;;  %s339_s5 = scalar_lea.hbm %s527_s1, 16 }
  0x2d   : > { %p336_p6 = scmp.ne.s32.totalorder %s334_s10, %s335_s2  ;;  %p340_p0 = scmp.lt.s32.totalorder %s334_s10, %s527_s1 }
  0x2e   : > { %p341_p1 = scmp.lt.s32.totalorder %s339_s5, %s335_s2 }
  0x2f   : > { %p337_p9 = pnand %p336_p6, %p448_p11 }
  0x30   : > { %p342_p3 = por %p341_p1, %p340_p0 }
  0x31   : > { %p338_p13 = pneg %p337_p9 }
  0x33   : > { %p343_p4 = pnand %p342_p3, %p338_p13 }
  0x35   : > { %346 = shalt.err (!%p343_p4)
}
  0x36   : > { %244 = dma.vmem_to_hbm [thread:$0]  (%p448_p11), %s156_s29, 128, %s158_s30, %s143_s17  }
  0x37 PF: > { %s169_s14 = sand.u32 1, %s373_s6   ;;  %p533_p7 = scmp.ge.s32.totalorder %s385_s9, 2 }
  0x38   : > { %s170_s16 = scalar_lea.sflag [#allocation4], %s169_s14 }
  0x39   : > { %p251_p5 = pnand %p533_p7, %p452_p12 }
  0x3b   : > { %p252_p8 = pneg %p251_p5 }
  0x3d   : > { %368 = dma.done.wait (%p252_p8), %s170_s16, 128  }
  0x3e   : > { %370 = vsyncadd (%p252_p8), %s170_s16, 4294967168  ;;  %p14_p10 = scmp.ge.s32.totalorder %s423_s12, 4   ;;  %s534_s6 = smov %s377_s7 }
  0x3f   : > { %s535_s7 = smov %s381_s8  ;;  %s536_s8 = smov %s435_s15 }
  0x40   : > { %s537_s9 = smov %s423_s12  ;;  %16 = sbr.rel (!%p14_p10) target bundleno = 5 (0x5), region = 69 }
  0x45   :  { %176 = vsyncpa [#allocation3], 1 }
  0x46   :  { %178 = vsyncpa [#allocation3 + $0x1], 1 }
  0x47   :  { %179 = vsyncpa [#allocation4], 1 }
  0x48   :  { %181 = vsyncpa [#allocation4 + $0x1], 1 }

</bundles_post_ra>
